<compile_context>
chip_gen: v7x
topology: tpu7x:2x2x1
jax: 0.10.0
libtpu: 0.0.40
codegen_flags: <defaults>
</compile_context>

<pallas_src>
import functools

import jax
import jax.numpy as jnp
from jax.experimental import pallas as pl
from jax.experimental.pallas import tpu as pltpu

HIDDEN = 128    # affine1 width (nn.Linear(obs, 128))
OUT_PAD = 128   # lane-dense fused-head output width (>= act + 1)
SMALL_B = 512   # at or below this batch, use the no-grid single-block path


def actor_critic_kernel(x_ref, w1_ref, b1_ref, wh_ref, bh_ref, out_ref, *, act):
    """relu(x@W1+b1) -> fused [action|value] head matmul -> masked softmax."""
    # --- affine1 + ReLU ------------------------------------------------------
    h = jnp.dot(x_ref[...], w1_ref[...], preferred_element_type=jnp.float32)
    h = jnp.maximum(h + b1_ref[...], 0.0)                          # [TB, 128]

    # --- fused action + value heads (single MXU pass, N = OUT_PAD) -----------
    fused = jnp.dot(h, wh_ref[...], preferred_element_type=jnp.float32)
    fused = fused + bh_ref[...]                                    # [TB, 128]

    # lanes 0..act-1: action scores ; lane act: state value ; rest: padding
    lane = jax.lax.broadcasted_iota(jnp.int32, fused.shape, dimension=1)
    is_action = lane < act
    is_value = lane == act

    # --- numerically stable softmax over the action lanes only ---------------
    scores = jnp.where(is_action, fused, -jnp.inf)
    m = jnp.max(scores, axis=-1, keepdims=True)
    e = jnp.where(is_action, jnp.exp(scores - m), 0.0)
    denom = jnp.sum(e, axis=-1, keepdims=True)
    r = pl.reciprocal(denom, approx=True)        # EUP vrcp (free slot)
    r = r * (2.0 - denom * r)                    # one Newton step (~1e-8 rel)
    probs = e * r                                # zero on all non-action lanes

    # --- single lane-dense output store: probs lanes + value lane ------------
    # NOTE: output stays f32 for bit-accurate downstream use; a bf16 slab would
    # halve the dominant HBM write traffic at large B if the consumer allows.
    out_ref[...] = probs + jnp.where(is_value, fused, 0.0)


def pack_params(params):
    """One-time packing of the fused-head weights/bias (hoisted out of forward).

    params: w1[obs,128], b1[128], wa[128,act], ba[act], wv[128,1], bv[1].
    Returns (w1, b1_2d, wh, bh, act).
    """
    hidden = params["w1"].shape[1]
    act = params["wa"].shape[1]
    assert hidden == HIDDEN
    assert act + 1 <= OUT_PAD, "action_shape + value lane must fit in OUT_PAD lanes"

    wh = jnp.zeros((hidden, OUT_PAD), jnp.float32)
    wh = wh.at[:, :act].set(params["wa"].astype(jnp.float32))
    wh = wh.at[:, act:act + 1].set(
        params["wv"].astype(jnp.float32).reshape(hidden, 1))
    bh = jnp.zeros((1, OUT_PAD), jnp.float32)
    bh = bh.at[0, :act].set(params["ba"].astype(jnp.float32))
    bh = bh.at[0, act].set(jnp.asarray(params["bv"], jnp.float32).reshape(()))

    w1 = params["w1"].astype(jnp.float32)
    b1 = params["b1"].astype(jnp.float32).reshape(1, hidden)
    return w1, b1, wh, bh, act


def _round8(n):
    return ((n + 7) // 8) * 8


def _cost(b_pad, obs, hidden, act):
    return pl.CostEstimate(
        flops=2 * b_pad * hidden * (obs + OUT_PAD),
        transcendentals=b_pad * act,                       # exp on action lanes only
        bytes_accessed=4 * (b_pad * obs + obs * hidden + hidden
                            + hidden * OUT_PAD + OUT_PAD + b_pad * OUT_PAD))


def _forward_impl(x, w1, b1, wh, bh, *, act, tb=1024):
    B, obs = x.shape
    hidden = w1.shape[1]
    kernel = functools.partial(actor_critic_kernel, act=act)

    if B <= SMALL_B:
        # Latency path (RL B=2 case): one block, no grid / pipeline machinery.
        b_pad = max(8, _round8(B))
        if b_pad != B:
            x = jnp.pad(x, ((0, b_pad - B), (0, 0)))
        out = pl.pallas_call(
            kernel,
            out_shape=jax.ShapeDtypeStruct((b_pad, OUT_PAD), jnp.float32),
            cost_estimate=_cost(b_pad, obs, hidden, act),
        )(x, w1, b1, wh, bh)
    else:
        # Throughput path: stream batch tiles; weights/biases stay VMEM-resident
        # via constant index maps (single fetch, default buffering).
        tb_eff = min(tb, 2048)
        tb_eff = min(tb_eff, _round8(pl.cdiv(B, 2)))   # keep grid >= 2 (v7x megacore)
        tb_eff = max(8, (tb_eff // 8) * 8)
        b_pad = pl.cdiv(B, tb_eff) * tb_eff
        if b_pad != B:
            x = jnp.pad(x, ((0, b_pad - B), (0, 0)))
        grid = (b_pad // tb_eff,)
        out = pl.pallas_call(
            kernel,
            out_shape=jax.ShapeDtypeStruct((b_pad, OUT_PAD), jnp.float32),
            grid=grid,
            in_specs=[
                pl.BlockSpec((tb_eff, obs), lambda i: (i, 0)),    # activations stream
                pl.BlockSpec((obs, hidden), lambda i: (0, 0)),    # resident weights
                pl.BlockSpec((1, hidden), lambda i: (0, 0)),
                pl.BlockSpec((hidden, OUT_PAD), lambda i: (0, 0)),
                pl.BlockSpec((1, OUT_PAD), lambda i: (0, 0)),
            ],
            out_specs=pl.BlockSpec((tb_eff, OUT_PAD), lambda i: (i, 0)),
            compiler_params=pltpu.CompilerParams(
                dimension_semantics=("parallel",)),
            cost_estimate=_cost(b_pad, obs, hidden, act),
        )(x, w1, b1, wh, bh)

    probs = out[:B, :act]
    value = out[:B, act:act + 1]
    return probs, value


# Jitted forward: wrapper pad/slice ops fuse into one XLA program per (B, act, tb).
actor_critic_forward = jax.jit(_forward_impl, static_argnames=("act", "tb"))


def init_params(key, obs_shape, action_shape, hidden=HIDDEN):
    """Deterministic synthetic init (weights stored as [in, out])."""
    k1, k2, k3, k4, k5, k6 = jax.random.split(key, 6)
    s1 = 1.0 / jnp.sqrt(obs_shape)
    s2 = 1.0 / jnp.sqrt(hidden)
    return {
        "w1": jax.random.uniform(k1, (obs_shape, hidden), jnp.float32, -s1, s1),
        "b1": jax.random.uniform(k2, (hidden,), jnp.float32, -s1, s1),
        "wa": jax.random.uniform(k3, (hidden, action_shape), jnp.float32, -s2, s2),
        "ba": jax.random.uniform(k4, (action_shape,), jnp.float32, -s2, s2),
        "wv": jax.random.uniform(k5, (hidden, 1), jnp.float32, -s2, s2),
        "bv": jax.random.uniform(k6, (1,), jnp.float32, -s2, s2),
    }


def _reference(x, params):
    h = jnp.maximum(x @ params["w1"] + params["b1"], 0.0)
    probs = jax.nn.softmax(h @ params["wa"] + params["ba"], axis=-1)
    value = h @ params["wv"] + params["bv"]
    return probs, value


if __name__ == "__main__":
    OBS, ACT = 16, 8
    key = jax.random.PRNGKey(0)
    kx, kp, kx2 = jax.random.split(key, 3)
    params = init_params(kp, OBS, ACT)
    w1, b1, wh, bh, act = pack_params(params)      # one-time packing (hoisted)

    # --- RL-sized call (B=2): no-grid latency path ---------------------------
    B = 2
    x = jax.random.normal(kx, (B, OBS), dtype=jnp.float32)
    probs, value = actor_critic_forward(x, w1, b1, wh, bh, act=act)
    jax.block_until_ready((probs, value))

    probs_ref, value_ref = _reference(x, params)
    assert probs.shape == (B, ACT) and value.shape == (B, 1)
    assert jnp.allclose(probs, probs_ref, atol=1e-5)
    assert jnp.allclose(value, value_ref, atol=1e-5)
    assert jnp.allclose(jnp.sum(probs, axis=-1), 1.0, atol=1e-5)

    # --- large batch: tiled grid path (>= 2 steps; ragged tail padding) ------
    B2 = 2088
    x2 = jax.random.normal(kx2, (B2, OBS), dtype=jnp.float32)
    probs2, value2 = actor_critic_forward(x2, w1, b1, wh, bh, act=act)
    jax.block_until_ready((probs2, value2))

    probs2_ref, value2_ref = _reference(x2, params)
    assert probs2.shape == (B2, ACT) and value2.shape == (B2, 1)
    assert jnp.allclose(probs2, probs2_ref, atol=1e-5)
    assert jnp.allclose(value2, value2_ref, atol=1e-5)
    assert jnp.allclose(jnp.sum(probs2, axis=-1), 1.0, atol=1e-5)

    print("KERNEL_OK")
</pallas_src>

<mosaic_0001>
module attributes {stable_mosaic.version = 11 : i64} {
  func.func @actor_critic_kernel(%arg0: memref<8x16xf32, #tpu.memory_space<vmem>>, %arg1: memref<16x128xf32, #tpu.memory_space<vmem>>, %arg2: memref<1x128xf32, #tpu.memory_space<vmem>>, %arg3: memref<128x128xf32, #tpu.memory_space<vmem>>, %arg4: memref<1x128xf32, #tpu.memory_space<vmem>>, %arg5: memref<8x128xf32, #tpu.memory_space<vmem>>) attributes {dimension_semantics = [], scalar_prefetch = 0 : i64, scratch_operands = 0 : i64, tpu.core_type = #tpu.core_type<tc>} {
    %c0 = arith.constant 0 : index
    %c0_0 = arith.constant 0 : index
    %0 = vector.load %arg0[%c0, %c0_0] : memref<8x16xf32, #tpu.memory_space<vmem>>, vector<8x16xf32>
    %c0_1 = arith.constant 0 : index
    %c0_2 = arith.constant 0 : index
    %1 = vector.load %arg1[%c0_1, %c0_2] : memref<16x128xf32, #tpu.memory_space<vmem>>, vector<16x128xf32>
    %cst = arith.constant dense<0.000000e+00> : vector<8x128xf32>
    %2 = tpu.matmul %0, %1, %cst {dimension_numbers = #tpu.dot_dimension_numbers<[1], [0], [0], [1], [0, 0, 1, 1], [], []>} : vector<8x16xf32>, vector<16x128xf32>, vector<8x128xf32> -> vector<8x128xf32>
    %c0_3 = arith.constant 0 : index
    %c0_4 = arith.constant 0 : index
    %3 = vector.load %arg2[%c0_3, %c0_4] : memref<1x128xf32, #tpu.memory_space<vmem>>, vector<1x128xf32>
    %4 = vector.broadcast %3 : vector<1x128xf32> to vector<8x128xf32>
    %5 = arith.addf %2, %4 : vector<8x128xf32>
    %cst_5 = arith.constant 0.000000e+00 : f32
    %6 = vector.broadcast %cst_5 : f32 to vector<8x128xf32>
    %7 = arith.maximumf %5, %6 : vector<8x128xf32>
    %c0_6 = arith.constant 0 : index
    %c0_7 = arith.constant 0 : index
    %8 = vector.load %arg3[%c0_6, %c0_7] : memref<128x128xf32, #tpu.memory_space<vmem>>, vector<128x128xf32>
    %cst_8 = arith.constant dense<0.000000e+00> : vector<8x128xf32>
    %9 = tpu.matmul %7, %8, %cst_8 {dimension_numbers = #tpu.dot_dimension_numbers<[1], [0], [0], [1], [0, 0, 1, 1], [], []>} : vector<8x128xf32>, vector<128x128xf32>, vector<8x128xf32> -> vector<8x128xf32>
    %c0_9 = arith.constant 0 : index
    %c0_10 = arith.constant 0 : index
    %10 = vector.load %arg4[%c0_9, %c0_10] : memref<1x128xf32, #tpu.memory_space<vmem>>, vector<1x128xf32>
    %11 = vector.broadcast %10 : vector<1x128xf32> to vector<8x128xf32>
    %12 = arith.addf %9, %11 : vector<8x128xf32>
    %13 = tpu.iota {dimensions = array<i32: 1>} : vector<8x128xi32>
    %c8_i32 = arith.constant 8 : i32
    %14 = vector.broadcast %c8_i32 : i32 to vector<8x128xi32>
    %15 = arith.cmpi slt, %13, %14 : vector<8x128xi32>
    %c8_i32_11 = arith.constant 8 : i32
    %16 = vector.broadcast %c8_i32_11 : i32 to vector<8x128xi32>
    %17 = arith.cmpi eq, %13, %16 : vector<8x128xi32>
    %cst_12 = arith.constant 0xFF800000 : f32
    %18 = vector.broadcast %cst_12 : f32 to vector<8x128xf32>
    %19 = arith.select %15, %12, %18 : vector<8x128xi1>, vector<8x128xf32>
    %cst_13 = arith.constant dense<0xFF800000> : vector<8xf32>
    %20 = vector.multi_reduction <maximumf>, %19, %cst_13 [1] : vector<8x128xf32> to vector<8xf32>
    %21 = vector.shape_cast %20 : vector<8xf32> to vector<8x1xf32>
    %22 = vector.broadcast %21 : vector<8x1xf32> to vector<8x128xf32>
    %23 = arith.subf %19, %22 : vector<8x128xf32>
    %24 = math.exp %23 : vector<8x128xf32>
    %cst_14 = arith.constant 0.000000e+00 : f32
    %25 = vector.broadcast %cst_14 : f32 to vector<8x128xf32>
    %26 = arith.select %15, %24, %25 : vector<8x128xi1>, vector<8x128xf32>
    %cst_15 = arith.constant dense<0.000000e+00> : vector<8xf32>
    %27 = vector.multi_reduction <add>, %26, %cst_15 [1] : vector<8x128xf32> to vector<8xf32>
    %28 = vector.shape_cast %27 : vector<8xf32> to vector<8x1xf32>
    %29 = tpu.reciprocal %28 {approx = true} : vector<8x1xf32> -> vector<8x1xf32>
    %30 = arith.mulf %28, %29 : vector<8x1xf32>
    %cst_16 = arith.constant 2.000000e+00 : f32
    %31 = vector.broadcast %cst_16 : f32 to vector<8x1xf32>
    %32 = arith.subf %31, %30 : vector<8x1xf32>
    %33 = arith.mulf %29, %32 : vector<8x1xf32>
    %34 = vector.broadcast %33 : vector<8x1xf32> to vector<8x128xf32>
    %35 = arith.mulf %26, %34 : vector<8x128xf32>
    %cst_17 = arith.constant 0.000000e+00 : f32
    %36 = vector.broadcast %cst_17 : f32 to vector<8x128xf32>
    %37 = arith.select %17, %12, %36 : vector<8x128xi1>, vector<8x128xf32>
    %38 = arith.addf %35, %37 : vector<8x128xf32>
    %c0_18 = arith.constant 0 : index
    %c0_19 = arith.constant 0 : index
    %39 = vector.load %arg5[%c0_18, %c0_19] : memref<8x128xf32, #tpu.memory_space<vmem>>, vector<8x128xf32>
    tpu.vector_store %arg5[%c0_18, %c0_19], %38 {strides = array<i32>} : memref<8x128xf32, #tpu.memory_space<vmem>>, vector<8x128xf32>,
    return
  }
}

</mosaic_0001>

<bundles_post_ra>
// kernel: _forward_impl.1
= control target key start
LH: loop header
LB: loop body
LE: loop exit
PB: predicated region body
PF: predicated region fallthrough
CT: control target
= control target key end

     0   :  { %10 = vsyncpa [#allocation3], 0  ;;  %s477_s0 = inlined_call_operand.vmem [shape: f32[8,16], index: 0, kind: input, shape index: {}]   ;;  %s478_s1 = inlined_call_operand.hbm [shape: f32[16,128], index: 1, kind: input, shape index: {}]   ;;  %s479_s2 = inlined_call_operand.vmem [shape: f32[1,128], index: 2, kind: input, shape index: {}]   ;;  %s480_s3 = inlined_call_operand.hbm [shape: f32[128,128], index: 3, kind: input, shape index: {}]   ;;  %s481_s4 = inlined_call_operand.vmem [shape: f32[1,128], index: 4, kind: input, shape index: {}]   ;;  %s482_s5 = inlined_call_operand.vmem [shape: f32[8,128], index: 5, kind: output, shape index: {}]  }
   0x1   :  { %11 = vsyncpa [#allocation5], 0  ;;  %s404_s18 = smov [#allocation2]   ;;  %s356_s22 = scalar_lea.hbm %s478_s1, 256 }
   0x2   :  { %s19_s19 = sshll.u32 %s404_s18, 4  ;;  %p357_p0 = scmp.ne.s32.totalorder %s478_s1, %s356_s22  ;;  %s20_s19 = int_to_ptr.vmem [resolvable:$true] %s19_s19 }
   0x3   :  { %p360_p1 = scmp.lt.u32.totalorder %s356_s22, %s478_s1 }
   0x5   :  { %p362_p2 = pnand %p360_p1, %p357_p0 }
   0x7   :  { %365 = shalt.err (!%p362_p2)
}
   0x8   :  { %s366_s27 = scalar_lea.vmem %s20_s19, 256  ;;  %p371_p4 = scmp.lt.s32.totalorder %s20_s19, %s20_s19 }
   0x9   :  { %p367_p3 = scmp.ne.s32.totalorder %s20_s19, %s366_s27  ;;  %p372_p5 = scmp.lt.s32.totalorder %s366_s27, %s366_s27 }
   0xb   :  { %p373_p6 = por %p372_p5, %p371_p4 }
   0xd   :  { %p374_p7 = pnand %p373_p6, %p367_p3 }
   0xf   :  { %377 = shalt.err (!%p374_p7)
}
  0x10   :  { %s405_s28 = smov 128   ;;  %s406_s29 = smov 8  }
  0x11   :  { %25 = dma.hbm_to_vmem [thread:$0]  %s478_s1, 256, %s20_s19, [#allocation3], %s405_s28, %s405_s28, %s406_s29  }
  0x12   :  { %s407_s7 = smov [#allocation4]   ;;  %s378_s11 = scalar_lea.hbm %s480_s3, 2048 }
  0x13   :  { %s33_s8 = sshll.u32 %s407_s7, 4  ;;  %p379_p8 = scmp.ne.s32.totalorder %s480_s3, %s378_s11  ;;  %s34_s8 = int_to_ptr.vmem [resolvable:$true] %s33_s8 }
  0x14   :  { %p382_p9 = scmp.lt.u32.totalorder %s378_s11, %s480_s3 }
  0x16   :  { %p384_p10 = pnand %p382_p9, %p379_p8 }
  0x18   :  { %387 = shalt.err (!%p384_p10)
}
  0x19   :  { %s388_s16 = scalar_lea.vmem %s34_s8, 2048  ;;  %p393_p12 = scmp.lt.s32.totalorder %s34_s8, %s34_s8 }
  0x1a   :  { %p389_p11 = scmp.ne.s32.totalorder %s34_s8, %s388_s16  ;;  %p394_p13 = scmp.lt.s32.totalorder %s388_s16, %s388_s16 }
  0x1c   :  { %p395_p0 = por %p394_p13, %p393_p12 }
  0x1e   :  { %p396_p1 = pnand %p395_p0, %p389_p11 }
  0x20   :  { %399 = shalt.err (!%p396_p1)
}
  0x21   :  { %39 = dma.hbm_to_vmem [thread:$0]  %s480_s3, 2048, %s34_s8, [#allocation5], %s405_s28, %s405_s28, %s406_s29  }
  0x22   :  { %400 = dma.done.wait [#allocation3], 256  }
  0x23   :  { %401 = vsyncadd [#allocation3], 4294967040 }
  0x24   :  { %402 = dma.done.wait [#allocation5], 2048  }
  0x25   :  { %403 = vsyncadd [#allocation5], 4294965248  ;;  %v408_v0 = vmov 0.0|0.0   ;;  %vm409_vm0 = vmmov 0   ;;  %v410_v1 = vmov 0.0   ;;  %v49_v2 = vld [vmem:[#allocation2] sm:$0xff]  ;;  %v226_v35 = vlaneseq }
  0x26   :  { %318 = vmatprep.subr.bf16.mxu0 %v408_v0  ;;  %280 = vmatprep.mubr.msk.f32.mxu0 %vm409_vm0, %v410_v1  ;;  %v50_v3 = vld [vmem:[#allocation2 + $0x8] sm:$0xff]  ;;  %v133_v5 = vld [vmem:[#allocation4] sm:$0xff]  ;;  %v134_v6 = vld [vmem:[#allocation4 + $0x8] sm:$0xff]  ;;  %vm58_vm1 = vcmask 130048  }
  0x27   :  { %321 = vmatprep.subr.bf16.mxu1 %v408_v0  ;;  %315 = vmatprep.mubr.msk.f32.mxu1 %vm409_vm0, %v410_v1  ;;  %v319_v4 = vpack.c.bf16 %v50_v3, %v49_v2  ;;  %v135_v7 = vld [vmem:[#allocation4 + $0x10] sm:$0xff]  ;;  %v322_v8 = vpack.c.bf16 %v134_v6, %v133_v5  ;;  %v136_v9 = vld [vmem:[#allocation4 + $0x18] sm:$0xff]  ;;  %v137_v12 = vld [vmem:[#allocation4 + $0x20] sm:$0xff]  ;;  %v227_v36 = vand.u32 127, %v226_v35 }
  0x28   :  { %v48_v10 = vld [vmem:[%s477_s0] sm:$0xff]  ;;  %v325_v11 = vpack.c.bf16 %v136_v9, %v135_v7  ;;  %v138_v13 = vld [vmem:[#allocation4 + $0x28] sm:$0xff]  ;;  %v140_v16 = vld [vmem:[#allocation4 + $0x38] sm:$0xff] }
  0x29   :  { %320 = vmatpush3.bf16.msra.mxu0 %v319_v4  ;;  %323 = vmatpush3.bf16.msra.mxu1 %v322_v8  ;;  %v328_v14 = vpack.c.bf16 %v138_v13, %v137_v12  ;;  %v139_v15 = vld [vmem:[#allocation4 + $0x30] sm:$0xff]  ;;  %v141_v18 = vld [vmem:[#allocation4 + $0x40] sm:$0xff]  ;;  %v142_v19 = vld [vmem:[#allocation4 + $0x48] sm:$0xff]  ;;  %vm229_vm2 = vcmp.eq.s32.totalorder %v227_v36, 8  ;;  %vm228_vm3 = vcmp.lt.s32.totalorder %v227_v36, 8 }
  0x2a   :  { %324 = vmatprep.subr.bf16.mxu1 %v408_v0  ;;  %v331_v17 = vpack.c.bf16 %v140_v16, %v139_v15  ;;  %v334_v20 = vpack.c.bf16 %v142_v19, %v141_v18  ;;  %v143_v21 = vld [vmem:[#allocation4 + $0x50] sm:$0xff]  ;;  %v144_v22 = vld [vmem:[#allocation4 + $0x58] sm:$0xff]  ;;  %v145_v24 = vld [vmem:[#allocation4 + $0x60] sm:$0xff] }
  0x2b   :  { %v337_v23 = vpack.c.bf16 %v144_v22, %v143_v21  ;;  %v146_v25 = vld [vmem:[#allocation4 + $0x68] sm:$0xff]  ;;  %v147_v27 = vld [vmem:[#allocation4 + $0x70] sm:$0xff]  ;;  %v148_v28 = vld [vmem:[#allocation4 + $0x78] sm:$0xff] }
  0x2c   :  { %281 = vmatmul.mubr.msk.f32.vlgmr.msra.gmra.mrb[0].mxu0 %vm58_vm1, %v48_v10  ;;  %v340_v26 = vpack.c.bf16 %v146_v25, %v145_v24  ;;  %v343_v29 = vpack.c.bf16 %v148_v28, %v147_v27  ;;  %v253_v30 = vld [vmem:[%s479_s2] ss:$0 sm:$0xff] }
  0x2d   :  { %326 = vmatpush3.bf16.msra.mxu1 %v325_v11  ;;  %v255_v37 = vld [vmem:[%s481_s4] ss:$0 sm:$0xff] }
  0x2e   :  { %327 = vmatprep.subr.bf16.mxu1 %v408_v0 }
  0x31   :  { %329 = vmatpush3.bf16.msra.mxu1 %v328_v14 }
  0x32   :  { %330 = vmatprep.subr.bf16.mxu1 %v408_v0 }
  0x35   :  { %332 = vmatpush3.bf16.msra.mxu1 %v331_v17 }
  0x36   :  { %333 = vmatprep.subr.bf16.mxu1 %v408_v0 }
  0x39   :  { %335 = vmatpush3.bf16.msra.mxu1 %v334_v20 }
  0x3a   :  { %336 = vmatprep.subr.bf16.mxu1 %v408_v0 }
  0x3d   :  { %338 = vmatpush3.bf16.msra.mxu1 %v337_v23 }
  0x3e   :  { %339 = vmatprep.subr.bf16.mxu1 %v408_v0 }
  0x41   :  { %341 = vmatpush3.bf16.msra.mxu1 %v340_v26 }
  0x42   :  { %342 = vmatprep.subr.bf16.mxu1 %v408_v0 }
  0x45   :  { %344 = vmatpush3.bf16.msra.mxu1 %v343_v29 }
  0xff   :  { %v128_v31 = vpop.f32.mrb[0].mxu0 }
 0x100   :  { %v129_v32 = vadd.f32 %v253_v30, %v128_v31  ;;  %v282_v33 = vpop.f32.mrb[1].mxu0 }
 0x102   :  { %v132_v34 = vmax.f32 %v129_v32, 0.0 }
 0x104   :  { %316 = vmatmul.mubr.f32.vlgmr.msra.gmra.mrb[0].mxu1 %v132_v34 }
 0x1d7   :  { %v222_v38 = vpop.f32.mrb[0].mxu1 }
 0x1d8   :  { %v223_v39 = vadd.f32 %v255_v37, %v222_v38  ;;  %v317_v40 = vpop.f32.mrb[1].mxu1 }
 0x1da   :  { %v244_v41 = vsel %vm229_vm2, %v223_v39, 0.0  ;;  %v230_v42 = vsel %vm228_vm3, %v223_v39, -inf }
 0x1db   :  { %231 = vmax.xlane.f32.xlu0 %v230_v42 }
 0x268   :  { %v232_v43 = vpop.xlane.xlu0 %231 }
 0x269   :  { %v233_v44 = vsub.f32 %v230_v42, %v232_v43 }
 0x26b   :  { %v234_v45 = vmul.f32 1.442695, %v233_v44 }
 0x26d   :  { %352 = vpow2.f32 %v234_v45 }
 0x277   :  { %v353_v46 = vpop.eup %352 }
 0x278   :  { %v236_v47 = vsel %vm228_vm3, %v353_v46, 0.0 }
 0x279   :  { %237 = vadd.xlane.f32.xlu0 %v236_v47 }
 0x306   :  { %v238_v48 = vpop.xlane.xlu0 %237 }
 0x307   :  { %354 = vrcp.f32 %v238_v48 }
 0x311   :  { %v355_v49 = vpop.eup %354 }
 0x312   :  { %v240_v50 = vmul.f32 %v355_v49, %v238_v48 }
 0x314   :  { %v241_v51 = vsub.f32 2.0, %v240_v50 }
 0x316   :  { %v242_v52 = vmul.f32 %v355_v49, %v241_v51 }
 0x318   :  { %v243_v53 = vmul.f32 %v242_v52, %v236_v47 }
 0x31a   :  { %v245_v54 = vadd.f32 %v244_v41, %v243_v53 }
 0x31c   :  { %246 = vst [vmem:[%s482_s5] sm:$0xff] %v245_v54 }
 0x31d   :  { %251 = vsyncpa [#allocation3], 1 }
 0x31e   :  { %252 = vsyncpa [#allocation5], 1 }

</bundles_post_ra>
